<compile_context>
chip_gen: v7x
topology: tpu7x:2x2x1
jax: 0.10.0
libtpu: 0.0.40
codegen_flags: <defaults>
</compile_context>

<pallas_src>
import functools

import jax
import jax.numpy as jnp
from jax.experimental import pallas as pl
from jax.experimental.pallas import tpu as pltpu


def _clamp_kernel(x_ref, o_ref, *, min_val, max_val):
    y = x_ref[...]
    if min_val is not None:
        y = jnp.maximum(y, min_val)   # max-then-min matches torch.clamp (min>max -> max)
    if max_val is not None:
        y = jnp.minimum(y, max_val)
    o_ref[...] = y.astype(o_ref.dtype)


def clamp_pallas(x, min_val=-1.0, max_val=1.0):
    """Elementwise clamp via a tiled, lane-dense Pallas TPU kernel.

    Matches torch.clamp(x, min=min_val, max=max_val) semantics for float
    tensors (min > max returns max; NaNs propagate).
    """
    orig_shape = x.shape
    orig_dtype = x.dtype
    total = x.size
    if total == 0:
        return x

    # ---- Bounds as Python scalars (compile-time immediates) ----------------
    if jnp.issubdtype(orig_dtype, jnp.floating):
        lo = None if min_val is None else float(min_val)
        hi = None if max_val is None else float(max_val)
    else:
        # TODO(synk): torch.clamp on int tensors with float bounds type-promotes
        # the result to float; here we truncate the bounds and keep the int dtype.
        lo = None if min_val is None else int(min_val)
        hi = None if max_val is None else int(max_val)

    itemsize = jnp.dtype(orig_dtype).itemsize

    # ---- Layout: lane-dense (rows, cols) slab, no padding -------------------
    cols = 0
    for c in (1024, 512, 256, 128):
        if total % c == 0:
            cols = c
            break
    if cols == 0:
        # No 128-multiple divides total: process full 128-wide rows in the
        # kernel, clamp the small ragged tail with plain jnp.clip.
        cols = 128

    xf = x.reshape(-1)                      # metadata-only for contiguous input
    main = (total // cols) * cols
    tail = total - main

    if main == 0:
        # Tiny input (< 128 elements): not worth a kernel launch.
        return jnp.clip(x, lo, hi)

    rows = main // cols
    x2d = xf[:main].reshape(rows, cols)     # metadata-only when tail == 0

    # ---- Dtype-aware tiling: ~2 MiB per block -------------------------------
    TARGET_BYTES = 2 << 20
    sublane = max(8, 32 // itemsize)        # f32: 8, bf16: 16, int8: 32
    tile_r = TARGET_BYTES // (cols * itemsize)
    tile_r = max(sublane, (tile_r // sublane) * sublane)
    TILE_R = rows if rows <= tile_r else tile_r   # full dim, or sublane multiple
    grid = (pl.cdiv(rows, TILE_R),)

    kernel = functools.partial(_clamp_kernel, min_val=lo, max_val=hi)

    out2d = pl.pallas_call(
        kernel,
        out_shape=jax.ShapeDtypeStruct((rows, cols), orig_dtype),
        grid=grid,
        in_specs=[pl.BlockSpec((TILE_R, cols), lambda i: (i, 0))],
        out_specs=pl.BlockSpec((TILE_R, cols), lambda i: (i, 0)),
        compiler_params=pltpu.CompilerParams(
            dimension_semantics=("parallel",)),
        cost_estimate=pl.CostEstimate(
            flops=2 * main,
            transcendentals=0,
            bytes_accessed=2 * main * itemsize),
    )(x2d)

    if tail == 0:
        return out2d.reshape(orig_shape)    # metadata-only

    # Rare ragged case: clamp the small tail outside the kernel.
    tail_out = jnp.clip(xf[main:], lo, hi).astype(orig_dtype)
    return jnp.concatenate([out2d.reshape(-1), tail_out]).reshape(orig_shape)


class ClampModule:
    """Mirror of the PyTorch Clamp nn.Module (no parameters)."""

    def __init__(self, min=-1.0, max=1.0):
        self.min = min
        self.max = max

    def __call__(self, x):
        return clamp_pallas(x, self.min, self.max)


if __name__ == "__main__":
    key = jax.random.PRNGKey(0)
    # Small NCHW input consistent with an activation inside a conv stack.
    x = jax.random.normal(key, (2, 4, 16, 16), dtype=jnp.float32) * 3.0

    module = ClampModule(min=-1.0, max=1.0)
    y = module(x)
    y = jax.block_until_ready(y)

    # Reference check against plain JAX clamp.
    y_ref = jnp.clip(x, -1.0, 1.0)
    assert y.shape == x.shape and y.dtype == x.dtype
    assert jnp.allclose(y, y_ref), "mismatch vs reference clamp"

    # Exercise a shape whose element count is not a multiple of 128 (tail path).
    x2 = jax.random.normal(jax.random.PRNGKey(1), (3, 5, 7), dtype=jnp.float32) * 3.0
    y2 = jax.block_until_ready(module(x2))
    assert jnp.allclose(y2, jnp.clip(x2, -1.0, 1.0)), "mismatch on ragged shape"

    print("KERNEL_OK")
</pallas_src>

<mosaic_0001>
module attributes {stable_mosaic.version = 11 : i64} {
  func.func @_clamp_kernel(%arg0: i32, %arg1: memref<2x1024xf32, #tpu.memory_space<vmem>>, %arg2: memref<2x1024xf32, #tpu.memory_space<vmem>>) attributes {dimension_semantics = [#tpu.dimension_semantics<parallel>], iteration_bounds = array<i64: 1>, scalar_prefetch = 0 : i64, scratch_operands = 0 : i64, tpu.core_type = #tpu.core_type<tc>, window_params = [{transform_indices = @transform_0, window_bounds = array<i64: 2, 1024>}, {transform_indices = @transform_1, window_bounds = array<i64: 2, 1024>}]} {
    %c0 = arith.constant 0 : index
    %c0_0 = arith.constant 0 : index
    %0 = vector.load %arg1[%c0, %c0_0] : memref<2x1024xf32, #tpu.memory_space<vmem>>, vector<2x1024xf32>
    %cst = arith.constant -1.000000e+00 : f32
    %1 = vector.broadcast %cst : f32 to vector<2x1024xf32>
    %2 = arith.maximumf %0, %1 : vector<2x1024xf32>
    %cst_1 = arith.constant 1.000000e+00 : f32
    %3 = vector.broadcast %cst_1 : f32 to vector<2x1024xf32>
    %4 = arith.minimumf %2, %3 : vector<2x1024xf32>
    %c0_2 = arith.constant 0 : index
    %c0_3 = arith.constant 0 : index
    %5 = vector.load %arg2[%c0_2, %c0_3] : memref<2x1024xf32, #tpu.memory_space<vmem>>, vector<2x1024xf32>
    tpu.vector_store %arg2[%c0_2, %c0_3], %4 {strides = array<i32>} : memref<2x1024xf32, #tpu.memory_space<vmem>>, vector<2x1024xf32>,
    return
  }
  func.func @transform_0(%arg0: i32) -> (i32, i32) {
    %c0_i32 = arith.constant 0 : i32
    %c0_i32_0 = arith.constant 0 : i32
    return %arg0, %c0_i32 : i32, i32
  }
  func.func @transform_1(%arg0: i32) -> (i32, i32) {
    %c0_i32 = arith.constant 0 : i32
    %c0_i32_0 = arith.constant 0 : i32
    return %arg0, %c0_i32 : i32, i32
  }
}

</mosaic_0001>

<bundles_post_ra>
// kernel: tpu_custom_call.1
= control target key start
LH: loop header
LB: loop body
LE: loop exit
PB: predicated region body
PF: predicated region fallthrough
CT: control target
= control target key end

     0   :  { %6 = vsyncpa [#allocation3], 0  ;;  %s132_s0 = inlined_call_operand.hbm [shape: f32[2,1024], index: 0, kind: input, shape index: {}]   ;;  %s133_s1 = inlined_call_operand.hbm [shape: f32[2,1024], index: 1, kind: output, shape index: {}]  }
   0x1   :  { %7 = vsyncpa [#allocation4], 0  ;;  %s96_s6 = smov [#allocation2]   ;;  %s48_s10 = scalar_lea.hbm %s132_s0, 256 }
   0x2   :  { %s14_s7 = sshll.u32 %s96_s6, 4  ;;  %p49_p0 = scmp.ne.s32.totalorder %s132_s0, %s48_s10  ;;  %s15_s7 = int_to_ptr.vmem [resolvable:$true] %s14_s7 }
   0x3   :  { %p52_p1 = scmp.lt.u32.totalorder %s48_s10, %s132_s0 }
   0x5   :  { %p54_p2 = pnand %p52_p1, %p49_p0 }
   0x7   :  { %57 = shalt.err (!%p54_p2)
}
   0x8   :  { %s58_s15 = scalar_lea.vmem %s15_s7, 256  ;;  %p63_p4 = scmp.lt.s32.totalorder %s15_s7, %s15_s7 }
   0x9   :  { %p59_p3 = scmp.ne.s32.totalorder %s15_s7, %s58_s15  ;;  %p64_p5 = scmp.lt.s32.totalorder %s58_s15, %s58_s15 }
   0xb   :  { %p65_p6 = por %p64_p5, %p63_p4 }
   0xd   :  { %p66_p7 = pnand %p65_p6, %p59_p3 }
   0xf   :  { %69 = shalt.err (!%p66_p7)
}
  0x10   :  { %17 = dma.hbm_to_vmem [thread:$0]  %s132_s0, 256, %s15_s7, [#allocation3]  }
  0x11   :  { %92 = dma.done.wait [#allocation3], 256  }
  0x12   :  { %93 = vsyncadd [#allocation3], 4294967040  ;;  %s97_s18 = smov [#allocation5]   ;;  %v21_v0 = vld [vmem:[#allocation2] sm:$0xff]  ;;  %v22_v1 = vld [vmem:[#allocation2 + $0x8] sm:$0xff] }
  0x13   :  { %s35_s19 = sshll.u32 %s97_s18, 4  ;;  %v44_v2 = vclamps-f32 %v21_v0, 1.0  ;;  %v45_v3 = vclamps-f32 %v22_v1, 1.0  ;;  %s36_s19 = int_to_ptr.vmem [resolvable:$true] %s35_s19 }
  0x14   :  { %s70_s20 = scalar_lea.vmem %s36_s19, 256  ;;  %p75_p9 = scmp.lt.s32.totalorder %s36_s19, %s36_s19 }
  0x15   :  { %27 = vst [vmem:[#allocation5] sm:$0xff] %v44_v2  ;;  %28 = vst [vmem:[#allocation5 + $0x8] sm:$0xff] %v45_v3  ;;  %p71_p8 = scmp.ne.s32.totalorder %s36_s19, %s70_s20  ;;  %p76_p10 = scmp.lt.s32.totalorder %s70_s20, %s70_s20 }
  0x17   :  { %p77_p11 = por %p76_p10, %p75_p9 }
  0x19   :  { %p78_p12 = pnand %p77_p11, %p71_p8 }
  0x1b   :  { %81 = shalt.err (!%p78_p12)
}
  0x1c   :  { %s82_s22 = scalar_lea.hbm %s133_s1, 256 }
  0x1d   :  { %p83_p13 = scmp.ne.s32.totalorder %s133_s1, %s82_s22  ;;  %p86_p0 = scmp.lt.u32.totalorder %s82_s22, %s133_s1 }
  0x1f   :  { %p88_p1 = pnand %p86_p0, %p83_p13 }
  0x21   :  { %91 = shalt.err (!%p88_p1)
}
  0x22   :  { %38 = dma.vmem_to_hbm [thread:$0]  %s36_s19, 256, %s133_s1, [#allocation4]  }
  0x23   :  { %94 = dma.done.wait [#allocation4], 256  }
  0x24   :  { %95 = vsyncadd [#allocation4], 4294967040 }
  0x25   :  { %42 = vsyncpa [#allocation3], 1 }
  0x26   :  { %43 = vsyncpa [#allocation4], 1 }

</bundles_post_ra>
